<compile_context>
chip_gen: v6e
topology: v6e:2x2x1
jax: 0.10.0
libtpu: 0.0.40
codegen_flags: <defaults>
</compile_context>

<pallas_src>
import functools

import jax
import jax.numpy as jnp
from jax.experimental import pallas as pl
from jax.experimental.pallas import tpu as pltpu


def _round_up(x, m):
    return (x + m - 1) // m * m


def _ce_kernel(golds_ref, logits_ref, out_ref, *, row_tile, n_rows, tiles_per_core):
    c = pl.program_id(0)   # core-parallel axis
    j = pl.program_id(1)   # sequential reduction axis

    @pl.when(j == 0)
    def _():
        out_ref[...] = jnp.zeros_like(out_ref)

    logits = logits_ref[...].astype(jnp.float32)          # (row_tile, V_pad) f32
    golds = golds_ref[...]                                 # (row_tile, 1) int32

    # One-hot gather of the gold logit (VPU compare+select, no XLU gather),
    # folded into the max-shifted pass so fewer (row_tile, V) temporaries live.
    col = jax.lax.broadcasted_iota(jnp.int32, logits.shape, 1)
    onehot = col == golds

    m = jnp.max(logits, axis=-1, keepdims=True)            # (row_tile, 1)
    shifted = logits - m
    sel = jnp.sum(jnp.where(onehot, shifted, 0.0), axis=-1, keepdims=True)
    sumexp = jnp.sum(jnp.exp(shifted), axis=-1, keepdims=True)
    per_tok = jnp.log(sumexp) - sel                        # = lse - logits[gold]

    # Validity mask: ignore_index==0 AND the logical row is inside the real
    # array (handles the ragged trailing block and clamped phantom blocks of
    # the 2-core split, regardless of what garbage the padded rows contain).
    base_row = (c * tiles_per_core + j) * row_tile
    row_idx = base_row + jax.lax.broadcasted_iota(jnp.int32, (row_tile, 1), 0)
    valid = (golds != 0) & (row_idx < n_rows)

    tile_sum = jnp.sum(jnp.where(valid, per_tok, 0.0))
    tile_cnt = jnp.sum(valid.astype(jnp.float32))

    # Accumulate into this core's resident (8,128) output block at [0,0]/[0,1]
    # using pure vector selects (no scalar VMEM indexing).
    rows = jax.lax.broadcasted_iota(jnp.int32, out_ref.shape, 0)
    cols = jax.lax.broadcasted_iota(jnp.int32, out_ref.shape, 1)
    out_ref[...] += (jnp.where((rows == 0) & (cols == 0), tile_sum, 0.0)
                     + jnp.where((rows == 0) & (cols == 1), tile_cnt, 0.0))


def _ce_reduce(logits, golds, *, n_rows, row_tile=None):
    """Returns (masked loss sum, count of non-ignored tokens) via Pallas."""
    n, v_pad = logits.shape
    itemsize = jnp.dtype(logits.dtype).itemsize

    if row_tile is None:
        # Conservative VMEM model: double-buffered input tile (2*itemsize/elem)
        # + ~20 B/elem of in-kernel f32 temporaries + lane-padded golds buffers.
        bytes_per_row = v_pad * (2 * itemsize + 20) + 1024
        budget = 40 * 1024 * 1024
        row_tile = max(8, min(1024, (budget // bytes_per_row) // 8 * 8))
    row_tile = max(8, min(row_tile, _round_up(n_rows, 8)))
    # TODO(synk): for extremely large vocab (V_pad*row_tile still too big) add a
    # vocab grid axis with online-softmax accumulation.

    n_blocks = pl.cdiv(n_rows, row_tile)
    num_cores = 2 if n_blocks >= 2 else 1      # v7x has 2 TCs; harmless elsewhere
    tiles_per_core = pl.cdiv(n_blocks, num_cores)

    def row_block(c, j):
        # Clamp phantom iterations (when tiles don't split evenly) onto the last
        # real block; their contribution is masked out by the logical-row test.
        t = jnp.minimum(c * tiles_per_core + j, n_blocks - 1)
        return (t, 0)

    kernel = functools.partial(_ce_kernel, row_tile=row_tile, n_rows=n_rows,
                               tiles_per_core=tiles_per_core)

    partials = pl.pallas_call(
        kernel,
        out_shape=jax.ShapeDtypeStruct((num_cores * 8, 128), jnp.float32),
        grid_spec=pltpu.PrefetchScalarGridSpec(
            num_scalar_prefetch=0,
            grid=(num_cores, tiles_per_core),
            in_specs=[
                pl.BlockSpec((row_tile, 1), row_block),      # golds
                pl.BlockSpec((row_tile, v_pad), row_block),  # logits
            ],
            out_specs=pl.BlockSpec((8, 128), lambda c, j: (c, 0)),
        ),
        compiler_params=pltpu.CompilerParams(
            dimension_semantics=("parallel", "arbitrary"),
            vmem_limit_bytes=48 * 1024 * 1024,
        ),
    )(golds, logits)

    loss_sum = jnp.sum(partials[:, 0])   # only row c*8 of each block is nonzero
    count = jnp.sum(partials[:, 1])
    return loss_sum, count


class CELossPallas:
    """JAX/Pallas port of parseq.eval.CELoss (mode='logits', smoothing=0.0)."""

    def __init__(self, reduction="mean", ignore_index=0, mode="logits",
                 contrib=1.0, row_tile=None):
        assert mode == "logits", "only mode='logits' implemented"
        assert reduction == "mean", "only reduction='mean' implemented"
        assert ignore_index == 0
        self.contrib = contrib
        self.row_tile = row_tile  # None => auto VMEM-budgeted tile
        # TODO(synk): label smoothing (q.SmoothedCELoss), class weights, and the
        # "gold id could not be generated" diagnostic print are not implemented.

    def __call__(self, probs, predactions, golds):
        b, tp, v = probs.shape
        tg = golds.shape[1]
        # time-dimension alignment, exactly as the torch module does it
        if tp < tg:
            extension = jnp.full((b, tg - tp, v), 1.0 / v, dtype=probs.dtype)
            probs = jnp.concatenate([probs, extension], axis=1)
        else:
            probs = probs[:, :tg]

        n = b * tg
        logits = probs.reshape(n, v)              # native dtype (bf16 stays bf16)
        v_pad = _round_up(v, 128)
        if v_pad != v:                            # lane-dense vocab
            logits = jnp.pad(logits, ((0, 0), (0, v_pad - v)),
                             constant_values=-1e30)
        golds_flat = golds.reshape(n, 1).astype(jnp.int32)

        loss_sum, count = _ce_reduce(logits, golds_flat, n_rows=n,
                                     row_tile=self.row_tile)
        loss = (loss_sum / count) * self.contrib  # mean over non-ignored tokens
        return {"loss": loss, "ce": loss}


def _reference(probs, golds, contrib=1.0):
    """Pure-JAX reference for correctness check."""
    b, tp, v = probs.shape
    tg = golds.shape[1]
    if tp < tg:
        ext = jnp.full((b, tg - tp, v), 1.0 / v, dtype=probs.dtype)
        probs = jnp.concatenate([probs, ext], axis=1)
    else:
        probs = probs[:, :tg]
    logp = jax.nn.log_softmax(probs.astype(jnp.float32), axis=-1)
    sel = jnp.take_along_axis(logp, golds[:, :, None].astype(jnp.int32), axis=-1)[..., 0]
    mask = golds != 0
    loss = -jnp.sum(jnp.where(mask, sel, 0.0)) / jnp.sum(mask)
    return loss * contrib


if __name__ == "__main__":
    key = jax.random.PRNGKey(0)
    k1, k2, k3, k4 = jax.random.split(key, 4)

    # --- test 1: small demo shape (B=2, T=8, V=32) -------------------------
    B, T, V = 2, 8, 32
    probs = jax.random.normal(k1, (B, T, V), dtype=jnp.float32)      # logits
    golds = jax.random.randint(k2, (B, T), minval=0, maxval=V, dtype=jnp.int32)
    golds = golds.at[:, -2:].set(0)                                  # some ignored
    predactions = jnp.argmax(probs, axis=-1)                         # unused by loss

    ce = CELossPallas()
    out = ce(probs, predactions, golds)
    loss = jax.block_until_ready(out["loss"])
    ref = _reference(probs, golds)
    assert jnp.allclose(loss, ref, rtol=1e-5, atol=1e-5), (loss, ref)

    # --- test 2: multi-tile + 2-way core split + ragged/phantom blocks +
    #             vocab padding + time-extension path (T_probs < T_gold) -----
    B2, Tp2, Tg2, V2 = 4, 70, 72, 200
    probs2 = jax.random.normal(k3, (B2, Tp2, V2), dtype=jnp.float32)
    golds2 = jax.random.randint(k4, (B2, Tg2), minval=0, maxval=V2, dtype=jnp.int32)
    golds2 = golds2.at[:, :3].set(0)
    ce2 = CELossPallas(row_tile=64)   # force multiple row tiles at this small N
    out2 = ce2(probs2, jnp.argmax(probs2, axis=-1), golds2)
    loss2 = jax.block_until_ready(out2["loss"])
    ref2 = _reference(probs2, golds2)
    assert jnp.allclose(loss2, ref2, rtol=1e-5, atol=1e-5), (loss2, ref2)

    # --- test 3: bf16 logits stay bf16 on the wire (no wrapper upcast) ------
    probs3 = probs.astype(jnp.bfloat16)
    out3 = CELossPallas()(probs3, predactions, golds)
    loss3 = jax.block_until_ready(out3["loss"])
    ref3 = _reference(probs3, golds)
    assert jnp.allclose(loss3, ref3, rtol=1e-3, atol=1e-3), (loss3, ref3)

    print("KERNEL_OK")
</pallas_src>

<mosaic_0001>
module attributes {stable_mosaic.version = 11 : i64} {
  func.func @_ce_kernel(%arg0: i32, %arg1: i32, %arg2: memref<16x1xi32, #tpu.memory_space<vmem>>, %arg3: memref<16x128xf32, #tpu.memory_space<vmem>>, %arg4: memref<8x128xf32, #tpu.memory_space<vmem>>) attributes {dimension_semantics = [#tpu.dimension_semantics<parallel>, #tpu.dimension_semantics<arbitrary>], iteration_bounds = array<i64: 1, 1>, scalar_prefetch = 0 : i64, scratch_operands = 0 : i64, tpu.core_type = #tpu.core_type<tc>, window_params = [{transform_indices = @transform_0, window_bounds = array<i64: 16, 1>}, {transform_indices = @transform_1, window_bounds = array<i64: 16, 128>}, {transform_indices = @transform_2, window_bounds = array<i64: 8, 128>}]} {
    %c0_i32 = arith.constant 0 : i32
    %0 = arith.cmpi eq, %arg1, %c0_i32 : i32
    %1 = arith.extui %0 : i1 to i32
    %c0_i32_0 = arith.constant 0 : i32
    %2 = arith.cmpi ne, %1, %c0_i32_0 : i32
    scf.if %2 {
      %cst_22 = arith.constant 0.000000e+00 : f32
      %66 = vector.broadcast %cst_22 : f32 to vector<8x128xf32>
      %c0_23 = arith.constant 0 : index
      %c0_24 = arith.constant 0 : index
      %67 = vector.load %arg4[%c0_23, %c0_24] : memref<8x128xf32, #tpu.memory_space<vmem>>, vector<8x128xf32>
      tpu.vector_store %arg4[%c0_23, %c0_24], %66 {strides = array<i32>} : memref<8x128xf32, #tpu.memory_space<vmem>>, vector<8x128xf32>,
    } else {
    }
    %c0 = arith.constant 0 : index
    %c0_1 = arith.constant 0 : index
    %3 = vector.load %arg3[%c0, %c0_1] : memref<16x128xf32, #tpu.memory_space<vmem>>, vector<16x128xf32>
    %c0_2 = arith.constant 0 : index
    %c0_3 = arith.constant 0 : index
    %4 = vector.load %arg2[%c0_2, %c0_3] : memref<16x1xi32, #tpu.memory_space<vmem>>, vector<16x1xi32>
    %5 = tpu.iota {dimensions = array<i32: 1>} : vector<16x128xi32>
    %6 = vector.broadcast %4 : vector<16x1xi32> to vector<16x128xi32>
    %7 = arith.cmpi eq, %5, %6 : vector<16x128xi32>
    %cst = arith.constant dense<0xFF800000> : vector<16xf32>
    %8 = vector.multi_reduction <maximumf>, %3, %cst [1] : vector<16x128xf32> to vector<16xf32>
    %9 = vector.shape_cast %8 : vector<16xf32> to vector<16x1xf32>
    %10 = vector.broadcast %9 : vector<16x1xf32> to vector<16x128xf32>
    %11 = arith.subf %3, %10 : vector<16x128xf32>
    %cst_4 = arith.constant 0.000000e+00 : f32
    %12 = vector.broadcast %cst_4 : f32 to vector<16x128xf32>
    %13 = arith.select %7, %11, %12 : vector<16x128xi1>, vector<16x128xf32>
    %cst_5 = arith.constant dense<0.000000e+00> : vector<16xf32>
    %14 = vector.multi_reduction <add>, %13, %cst_5 [1] : vector<16x128xf32> to vector<16xf32>
    %15 = vector.shape_cast %14 : vector<16xf32> to vector<16x1xf32>
    %16 = math.exp %11 : vector<16x128xf32>
    %cst_6 = arith.constant dense<0.000000e+00> : vector<16xf32>
    %17 = vector.multi_reduction <add>, %16, %cst_6 [1] : vector<16x128xf32> to vector<16xf32>
    %18 = vector.shape_cast %17 : vector<16xf32> to vector<16x1xf32>
    %19 = math.log %18 : vector<16x1xf32>
    %20 = arith.subf %19, %15 : vector<16x1xf32>
    %c1_i32 = arith.constant 1 : i32
    %21 = arith.muli %arg0, %c1_i32 : i32
    %22 = arith.addi %21, %arg1 : i32
    %c16_i32 = arith.constant 16 : i32
    %23 = arith.muli %22, %c16_i32 : i32
    %24 = tpu.iota {dimensions = array<i32: 0>} : vector<16x1xi32>
    %25 = vector.broadcast %23 : i32 to vector<16x1xi32>
    %26 = arith.addi %25, %24 : vector<16x1xi32>
    %c0_i32_7 = arith.constant 0 : i32
    %27 = vector.broadcast %c0_i32_7 : i32 to vector<16x1xi32>
    %28 = arith.cmpi ne, %4, %27 : vector<16x1xi32>
    %c16_i32_8 = arith.constant 16 : i32
    %29 = vector.broadcast %c16_i32_8 : i32 to vector<16x1xi32>
    %30 = arith.cmpi slt, %26, %29 : vector<16x1xi32>
    %31 = arith.andi %28, %30 : vector<16x1xi1>
    %cst_9 = arith.constant 0.000000e+00 : f32
    %32 = vector.broadcast %cst_9 : f32 to vector<16x1xf32>
    %33 = arith.select %31, %20, %32 : vector<16x1xi1>, vector<16x1xf32>
    %34 = vector.shape_cast %33 : vector<16x1xf32> to vector<1x16x1xf32>
    %cst_10 = arith.constant dense<0.000000e+00> : vector<1xf32>
    %35 = vector.multi_reduction <add>, %34, %cst_10 [1, 2] : vector<1x16x1xf32> to vector<1xf32>
    %36 = vector.shape_cast %35 : vector<1xf32> to vector<1x1x1xf32>
    %37 = vector.extract %36[0, 0, 0] : f32 from vector<1x1x1xf32>
    %38 = arith.extui %31 : vector<16x1xi1> to vector<16x1xi32>
    %39 = arith.sitofp %38 : vector<16x1xi32> to vector<16x1xf32>
    %40 = vector.shape_cast %39 : vector<16x1xf32> to vector<1x16x1xf32>
    %cst_11 = arith.constant dense<0.000000e+00> : vector<1xf32>
    %41 = vector.multi_reduction <add>, %40, %cst_11 [1, 2] : vector<1x16x1xf32> to vector<1xf32>
    %42 = vector.shape_cast %41 : vector<1xf32> to vector<1x1x1xf32>
    %43 = vector.extract %42[0, 0, 0] : f32 from vector<1x1x1xf32>
    %44 = tpu.iota {dimensions = array<i32: 0>} : vector<8x128xi32>
    %45 = tpu.iota {dimensions = array<i32: 1>} : vector<8x128xi32>
    %c0_12 = arith.constant 0 : index
    %c0_13 = arith.constant 0 : index
    %46 = vector.load %arg4[%c0_12, %c0_13] : memref<8x128xf32, #tpu.memory_space<vmem>>, vector<8x128xf32>
    %c0_i32_14 = arith.constant 0 : i32
    %47 = vector.broadcast %c0_i32_14 : i32 to vector<8x128xi32>
    %48 = arith.cmpi eq, %44, %47 : vector<8x128xi32>
    %c0_i32_15 = arith.constant 0 : i32
    %49 = vector.broadcast %c0_i32_15 : i32 to vector<8x128xi32>
    %50 = arith.cmpi eq, %45, %49 : vector<8x128xi32>
    %51 = arith.andi %48, %50 : vector<8x128xi1>
    %cst_16 = arith.constant 0.000000e+00 : f32
    %52 = vector.broadcast %37 : f32 to vector<8x128xf32>
    %53 = vector.broadcast %cst_16 : f32 to vector<8x128xf32>
    %54 = arith.select %51, %52, %53 : vector<8x128xi1>, vector<8x128xf32>
    %c0_i32_17 = arith.constant 0 : i32
    %55 = vector.broadcast %c0_i32_17 : i32 to vector<8x128xi32>
    %56 = arith.cmpi eq, %44, %55 : vector<8x128xi32>
    %c1_i32_18 = arith.constant 1 : i32
    %57 = vector.broadcast %c1_i32_18 : i32 to vector<8x128xi32>
    %58 = arith.cmpi eq, %45, %57 : vector<8x128xi32>
    %59 = arith.andi %56, %58 : vector<8x128xi1>
    %cst_19 = arith.constant 0.000000e+00 : f32
    %60 = vector.broadcast %43 : f32 to vector<8x128xf32>
    %61 = vector.broadcast %cst_19 : f32 to vector<8x128xf32>
    %62 = arith.select %59, %60, %61 : vector<8x128xi1>, vector<8x128xf32>
    %63 = arith.addf %54, %62 : vector<8x128xf32>
    %64 = arith.addf %46, %63 : vector<8x128xf32>
    %c0_20 = arith.constant 0 : index
    %c0_21 = arith.constant 0 : index
    %65 = vector.load %arg4[%c0_20, %c0_21] : memref<8x128xf32, #tpu.memory_space<vmem>>, vector<8x128xf32>
    tpu.vector_store %arg4[%c0_20, %c0_21], %64 {strides = array<i32>} : memref<8x128xf32, #tpu.memory_space<vmem>>, vector<8x128xf32>,
    return
  }
  func.func @transform_0(%arg0: i32, %arg1: i32) -> (i32, i32) {
    %c1_i32 = arith.constant 1 : i32
    %0 = arith.muli %arg0, %c1_i32 : i32
    %1 = arith.addi %0, %arg1 : i32
    %c0_i32 = arith.constant 0 : i32
    %2 = arith.minsi %1, %c0_i32 : i32
    %c0_i32_0 = arith.constant 0 : i32
    %c0_i32_1 = arith.constant 0 : i32
    return %2, %c0_i32_0 : i32, i32
  }
  func.func @transform_1(%arg0: i32, %arg1: i32) -> (i32, i32) {
    %c1_i32 = arith.constant 1 : i32
    %0 = arith.muli %arg0, %c1_i32 : i32
    %1 = arith.addi %0, %arg1 : i32
    %c0_i32 = arith.constant 0 : i32
    %2 = arith.minsi %1, %c0_i32 : i32
    %c0_i32_0 = arith.constant 0 : i32
    %c0_i32_1 = arith.constant 0 : i32
    return %2, %c0_i32_0 : i32, i32
  }
  func.func @transform_2(%arg0: i32, %arg1: i32) -> (i32, i32) {
    %c0_i32 = arith.constant 0 : i32
    %c0_i32_0 = arith.constant 0 : i32
    return %arg0, %c0_i32 : i32, i32
  }
}

</mosaic_0001>

<bundles_post_ra>
// kernel: tpu_custom_call.1
= control target key start
LH: loop header
LB: loop body
LE: loop exit
PB: predicated region body
PF: predicated region fallthrough
CT: control target
= control target key end

     0   :  { %v246_v2 = vmov 0   ;;  %s293_s0 = inlined_call_operand.vmem [shape: s32[16,1], index: 0, kind: input, shape index: {}]   ;;  %s294_s1 = inlined_call_operand.vmem [shape: f32[16,128], index: 1, kind: input, shape index: {}]   ;;  %s295_s2 = inlined_call_operand.hbm [shape: f32[8,128], index: 2, kind: output, shape index: {}]  }
   0x1   :  { %v81_v0 = vld [vmem:[%s294_s1] sm:$0xff]  ;;  %214 = vset.pattern.permute.xlu1 %v246_v2 }
   0x2   :  { %v83_v1 = vld [vmem:[%s293_s0] sm:$0xff]  ;;  %95 = vmax.xlane.f32.xlu0 %v81_v0 }
   0x3   :  { %7 = vsyncpa [#allocation3], 0  ;;  %v82_v3 = vld [vmem:[%s294_s1 + $0x8] sm:$0xff]  ;;  %88 = vperm.xlu1 %214, %v83_v1   ;;  %215 = vset.pattern.permute.xlu0 %v246_v2  ;;  %v85_v11 = vlaneseq  ;;  %vm129_vm2 = vcmp.ne.s32.totalorder %v83_v1, 0  ;;  %v247_v19 = vmov 0.0   ;;  %vm137_vm4 = vcmask 7168  }
   0x4   :  { %v84_v4 = vld [vmem:[%s293_s0 + $0x8] sm:$0xff]  ;;  %v205_v20 = vsel %vm129_vm2, 1.0, %v247_v19  ;;  %s248_s17 = smov [#allocation2]  }
   0x5   :  { %v276_v13 = vand.u32 127, %v85_v11  ;;  %vm130_vm3 = vcmp.ne.s32.totalorder %v84_v4, 0  ;;  %v154_v22 = vsel %vm137_vm4, %v205_v20, 0.0  ;;  %v124_v54 = vshrl.u32 %v85_v11, 7  ;;  %s185_s18 = sshll.u32 %s248_s17, 4  ;;  %s186_s18 = int_to_ptr.vmem [resolvable:$true] %s185_s18 }
   0x6   :  { %97 = vmax.xlane.f32.xlu0 %v82_v3  ;;  %v206_v21 = vsel %vm130_vm3, 1.0, %v247_v19  ;;  %s224_s19 = scalar_lea.vmem %s186_s18, 128  ;;  %p229_p1 = scmp.lt.s32.totalorder %s186_s18, %s186_s18 }
   0x7   :  { %91 = vperm.xlu1 %214, %v84_v4   ;;  %v155_v23 = vsel %vm137_vm4, %v206_v21, 0.0  ;;  %vm167_vm5 = vcmp.eq.s32.totalorder %v124_v54, 0  ;;  %vm168_vm6 = vcmp.eq.s32.totalorder %v276_v13, 0  ;;  %vm172_vm7 = vcmp.eq.s32.totalorder %v276_v13, 1  ;;  %p225_p0 = scmp.ne.s32.totalorder %s186_s18, %s224_s19  ;;  %p230_p2 = scmp.lt.s32.totalorder %s224_s19, %s224_s19 }
   0x8   :  { %v156_v24 = vadd.f32 %v155_v23, %v154_v22  ;;  %vm169_vm8 = vmand %vm167_vm5, %vm168_vm6 }
   0x9   :  { %vm173_vm9 = vmand %vm167_vm5, %vm172_vm7  ;;  %p231_p3 = por %p230_p2, %p229_p1 }
   0xb   :  { %p232_p4 = pnand %p231_p3, %p225_p0 }
  0x7e   :  { %v89_v12 = vpop.permute.xlu1 %88 }
  0x7f   :  { %vm93_vm0 = vcmp.eq.s32.totalorder %v276_v13, %v89_v12 }
  0x82   :  { %v92_v15 = vpop.permute.xlu1 %91 }
  0x83   :  { %vm94_vm1 = vcmp.eq.s32.totalorder %v276_v13, %v92_v15 }
  0x8b   :  { %v96_v5 = vpop.xlane.xlu0 %95 }
  0x8c   :  { %v99_v6 = vsub.f32 %v81_v0, %v96_v5 }
  0x8e   :  { %v107_v7 = vmul.f32 1.442695, %v99_v6  ;;  %v101_v17 = vsel %vm93_vm0, %v99_v6, 0.0 }
  0x8f   :  { %v98_v8 = vpop.xlane.xlu0 %97 }
  0x90   :  { %216 = vpow2.f32 %v107_v7  ;;  %v100_v9 = vsub.f32 %v82_v3, %v98_v8 }
  0x92   :  { %v109_v10 = vmul.f32 1.442695, %v100_v9  ;;  %v102_v18 = vsel %vm94_vm1, %v100_v9, 0.0 }
  0x94   :  { %218 = vpow2.f32 %v109_v10 }
  0x9d   :  { %v217_v14 = vpop.eup %216 }
  0x9e   :  { %111 = vadd.xlane.f32.xlu0 %v217_v14 }
  0xa1   :  { %v219_v16 = vpop.eup %218 }
  0xa2   :  { %103 = vadd.xlane.f32.xlu0 %v101_v17  ;;  %113 = vadd.xlane.f32.xlu1 %v219_v16 }
  0xa6   :  { %105 = vadd.xlane.f32.xlu0 %v102_v18 }
 0x127   :  { %v112_v25 = vpop.xlane.xlu0 %111 }
 0x128   :  { %220 = vlog2.f32 %v112_v25 }
 0x12b   :  { %v114_v26 = vpop.xlane.xlu1 %113  ;;  %v104_v28 = vpop.xlane.xlu0 %103 }
 0x12c   :  { %222 = vlog2.f32 %v114_v26 }
 0x12f   :  { %v106_v33 = vpop.xlane.xlu0 %105 }
 0x135   :  { %v221_v27 = vpop.eup %220 }
 0x136   :  { %v116_v29 = vmul.f32 0.6931472, %v221_v27 }
 0x138   :  { %v119_v30 = vsub.f32 %v116_v29, %v104_v28 }
 0x139   :  { %v223_v31 = vpop.eup %222 }
 0x13a   :  { %v118_v32 = vmul.f32 0.6931472, %v223_v31  ;;  %v135_v34 = vsel %vm129_vm2, %v119_v30, 0.0 }
 0x13b   :  { %v138_v37 = vsel %vm137_vm4, %v135_v34, 0.0 }
 0x13c   :  { %v120_v35 = vsub.f32 %v118_v32, %v106_v33 }
 0x13e   :  { %v136_v36 = vsel %vm130_vm3, %v120_v35, 0.0 }
 0x13f   :  { %v139_v38 = vsel %vm137_vm4, %v136_v36, 0.0 }
 0x140   :  { %v140_v39 = vadd.f32 %v139_v38, %v138_v37 }
 0x142   :  { %141 = vadd.xlane.f32.xlu0 %v140_v39 }
 0x146   :  { %157 = vadd.xlane.f32.xlu0 %v156_v24 }
 0x1cb   :  { %v142_v40 = vpop.xlane.xlu0 %141 }
 0x1cc   :  { %v143_v41 = vrot.slane %v142_v40, 4 }
 0x1ce   :  { %v144_v42 = vadd.f32 %v143_v41, %v142_v40 }
 0x1cf   :  { %v158_v43 = vpop.xlane.xlu0 %157 }
 0x1d0   :  { %v145_v44 = vrot.slane %v144_v42, 2  ;;  %v159_v45 = vrot.slane %v158_v43, 4 }
 0x1d2   :  { %v160_v46 = vadd.f32 %v159_v45, %v158_v43  ;;  %v146_v47 = vadd.f32 %v145_v44, %v144_v42 }
 0x1d4   :  { %v161_v48 = vrot.slane %v160_v46, 2  ;;  %v147_v49 = vrot.slane %v146_v47, 1 }
 0x1d6   :  { %v162_v50 = vadd.f32 %v161_v48, %v160_v46  ;;  %v148_v51 = vadd.f32 %v147_v49, %v146_v47 }
 0x1d8   :  { %207 = vpush %v148_v51  ;;  %v163_v52 = vrot.slane %v162_v50, 1 }
 0x1da   :  { %v164_v53 = vadd.f32 %v163_v52, %v162_v50 }
 0x1dc   :  { %209 = vpush %v164_v53 }
 0x209   :  { %s208_s0 = spop %207 }
 0x20a   :  { %v170_v55 = vstv %s208_s0 }
 0x20b   :  { %v171_v57 = vsel %vm169_vm8, %v170_v55, 0.0 }
 0x20d   :  { %s210_s1 = spop %209 }
 0x20e   :  { %v174_v56 = vstv %s210_s1 }
 0x20f   :  { %v175_v58 = vsel %vm173_vm9, %v174_v56, 0.0 }
 0x210   :  { %v176_v59 = vadd.f32 %v175_v58, %v171_v57 }
 0x212   :  { %178 = vst [vmem:[#allocation2] sm:$0xff] %v176_v59 }
 0x213   :  { %235 = shalt.err (!%p232_p4)
}
 0x214   :  { %188 = dma.vmem_to_hbm [thread:$0]  %s186_s18, 128, %s295_s2, [#allocation3]  }
 0x215   :  { %244 = dma.done.wait [#allocation3], 128  }
 0x216   :  { %245 = vsyncadd [#allocation3], 4294967168 }
 0x217   :  { %192 = vsyncpa [#allocation3], 1 }

</bundles_post_ra>
